<compile_context>
chip_gen: v7x
topology: tpu7x:2x2x1
jax: 0.10.0
libtpu: 0.0.40
codegen_flags: <defaults>
</compile_context>

<pallas_src>
from collections import OrderedDict

import jax
import jax.numpy as jnp
from jax.experimental import pallas as pl
from jax.experimental.pallas import tpu as pltpu

# ----------------------------------------------------------------------------
# deterministic per-tensor quantization parameters (emulating torch qint8)
# ----------------------------------------------------------------------------
Q_SCALE = 0.05      # quantizer (input) scale
Q_ZP = 0            # quantizer (input) zero point
QOUT_SCALE = 0.1    # quantized-module / quantized-add output scale
QOUT_ZP = 0
QMIN, QMAX = -128, 127


class QuantTensor:
    """Stand-in for a torch qint8 tensor: int8 values + scale + zero_point."""

    def __init__(self, values, scale, zero_point):
        self.values = values            # int8, NHWC
        self.scale = scale
        self.zero_point = zero_point


def _is_quant(x):
    return isinstance(x, QuantTensor)


# ----------------------------------------------------------------------------
# in-kernel helpers (traced inside kernels)
# ----------------------------------------------------------------------------
def _dequant(q):
    return (q.astype(jnp.float32) - Q_ZP) * Q_SCALE


def _fake_quant(x):
    # quantize -> dequantize on the Q_SCALE grid (math-identical to running
    # the standalone quantizer first and dequantizing inside the consumer)
    q = jnp.clip(jnp.round(x / Q_SCALE) + Q_ZP, QMIN, QMAX)
    return (q - Q_ZP) * Q_SCALE


def _requant(y):
    q = jnp.clip(jnp.round(y / QOUT_SCALE) + QOUT_ZP, QMIN, QMAX)
    return q.astype(jnp.int8)


# ----------------------------------------------------------------------------
# Pallas kernels
# ----------------------------------------------------------------------------
def _quantize_kernel(x_ref, q_ref):
    q = jnp.round(x_ref[...] / Q_SCALE) + Q_ZP
    q_ref[...] = jnp.clip(q, QMIN, QMAX).astype(jnp.int8)


def _dequantize_kernel(q_ref, x_ref):
    x_ref[...] = _dequant(q_ref[...])


def _make_add_kernel(x_is_quant, y_is_quant, quant_out):
    """Fused (de/fake-)quant + add (+ requant) elementwise kernel."""
    def kernel(x_ref, y_ref, o_ref):
        x = x_ref[...]
        y = y_ref[...]
        if quant_out:
            xf = _dequant(x) if x_is_quant else _fake_quant(x)
            yf = _dequant(y) if y_is_quant else _fake_quant(y)
            o_ref[...] = _requant(xf + yf)
        else:
            xf = _dequant(x) if x_is_quant else x
            yf = _dequant(y) if y_is_quant else y
            o_ref[...] = xf + yf
    return kernel


def _make_conv_kernel(in_is_quant, quant_out):
    """Fused (de/fake-)quant + 1x1-conv matmul (+ requant) kernel.

    TODO(synk): on v5e/v6e an int8xint8->int32 MXU matmul (bf16 on v7x, which
    has no integer MXU) would halve operand DMA bytes; kept in f32 here for
    cross-chip portability and exact-match numerics.
    """
    def kernel(x_ref, w_ref, b_ref, o_ref):
        x = x_ref[...]
        if quant_out:
            xf = _dequant(x) if in_is_quant else _fake_quant(x)
        else:
            xf = _dequant(x) if in_is_quant else x
        y = jnp.dot(xf, w_ref[...], preferred_element_type=jnp.float32) + b_ref[...]
        o_ref[...] = _requant(y) if quant_out else y
    return kernel


_ADD_KERNELS = {
    (xq, yq, qo): _make_add_kernel(xq, yq, qo)
    for xq in (False, True) for yq in (False, True) for qo in (False, True)
}
_CONV_KERNELS = {
    (inq, qo): _make_conv_kernel(inq, qo)
    for inq in (False, True) for qo in (False, True)
}

_PARALLEL_1D = pltpu.CompilerParams(dimension_semantics=("parallel",))


# ----------------------------------------------------------------------------
# pallas_call wrappers (tiled)
# ----------------------------------------------------------------------------
def _elementwise_call(kernel, out_dtype, *arrays):
    """View flattened as a lane-dense (rows, lanes) slab and tile over rows."""
    shape = arrays[0].shape
    total = arrays[0].size
    lanes = None
    for cand in (2048, 1024, 512, 256, 128):        # widest lane-dense view
        if total % cand == 0:
            lanes = cand
            break
    if lanes is None:
        # TODO(synk): pad + mask for sizes not divisible by 128.
        raise ValueError("elementwise path requires size divisible by 128")
    rows = total // lanes
    # Row tile: multiple of 32 (int8 sublane packing), ~<=1 MiB f32 per block,
    # and dividing `rows` so every block is full (unmasked stores).
    max_tr = max(32, (1 << 18) // lanes)
    tr = rows
    for cand in (1024, 512, 256, 128, 64, 32):
        if cand <= max_tr and rows % cand == 0:
            tr = cand
            break
    flat = [a.reshape(rows, lanes) for a in arrays]
    out = pl.pallas_call(
        kernel,
        grid=(rows // tr,),
        in_specs=[pl.BlockSpec((tr, lanes), lambda i: (i, 0)) for _ in flat],
        out_specs=pl.BlockSpec((tr, lanes), lambda i: (i, 0)),
        out_shape=jax.ShapeDtypeStruct((rows, lanes), out_dtype),
        compiler_params=_PARALLEL_1D,
    )(*flat)
    return out.reshape(shape)


def _conv1x1_call(kernel, x_rows, w, b, out_dtype):
    """(M, Cin) @ (Cin, Cout) + bias, tiled over M with weight/bias resident."""
    m, cin = x_rows.shape
    cout = w.shape[1]
    tm = m
    for cand in (256, 512, 128, 64, 32, 16, 8):
        if m % cand == 0:
            tm = cand
            break
    return pl.pallas_call(
        kernel,
        grid=(m // tm,),
        in_specs=[pl.BlockSpec((tm, cin), lambda i: (i, 0)),
                  pl.BlockSpec((cin, cout), lambda i: (0, 0)),   # resident
                  pl.BlockSpec((1, cout), lambda i: (0, 0))],    # resident
        out_specs=pl.BlockSpec((tm, cout), lambda i: (i, 0)),
        out_shape=jax.ShapeDtypeStruct((m, cout), out_dtype),
        compiler_params=_PARALLEL_1D,
    )(x_rows, w, b)


def _rows_view(x):
    # NHWC activations: merging leading dims is a free reshape (no transpose).
    return x.reshape(-1, x.shape[-1])


# ----------------------------------------------------------------------------
# Wrapped modules (deterministic 1x1 conv) and quantizer / dequantizer
# ----------------------------------------------------------------------------
class FloatConv1x1Module:
    """Float wrapped module (plays the role of gpu_module / cpu_module)."""

    def __init__(self, weight, bias):
        self.weight = weight        # (Cin, Cout)
        self.bias = bias            # (1, Cout)

    def __call__(self, x):          # x: float32 NHWC or QuantTensor (fused dequant)
        is_q = _is_quant(x)
        vals = x.values if is_q else x
        out_rows = _conv1x1_call(_CONV_KERNELS[(is_q, False)], _rows_view(vals),
                                 self.weight, self.bias, jnp.float32)
        return out_rows.reshape(vals.shape[:-1] + (self.weight.shape[1],))

    # torch.nn.quantized.FloatFunctional-style helpers (dequant fused in)
    def add(self, x, y):
        xq, yq = _is_quant(x), _is_quant(y)
        xa = x.values if xq else x
        ya = y.values if yq else y
        return _elementwise_call(_ADD_KERNELS[(xq, yq, False)], jnp.float32, xa, ya)

    def cat(self, tensors, dim=0):
        # TODO(synk): pure memory movement; done in XLA glue, not in a kernel.
        return jnp.concatenate(list(tensors), axis=dim)


class QuantConv1x1Module:
    """Quantized wrapped module (plays the role of quant_module)."""

    def __init__(self, weight, bias):
        self.weight = weight
        self.bias = bias

    def __call__(self, x):          # x: QuantTensor or float (fused fake-quant)
        is_q = _is_quant(x)
        vals = x.values if is_q else x
        out_rows = _conv1x1_call(_CONV_KERNELS[(is_q, True)], _rows_view(vals),
                                 self.weight, self.bias, jnp.int8)
        out = out_rows.reshape(vals.shape[:-1] + (self.weight.shape[1],))
        return QuantTensor(out, QOUT_SCALE, QOUT_ZP)

    def add(self, x, y):            # fused (de/fake-)quant + add + requant
        xq, yq = _is_quant(x), _is_quant(y)
        xa = x.values if xq else x
        ya = y.values if yq else y
        vals = _elementwise_call(_ADD_KERNELS[(xq, yq, True)], jnp.int8, xa, ya)
        return QuantTensor(vals, QOUT_SCALE, QOUT_ZP)

    def cat(self, qtensors, dim=0):
        vals = jnp.concatenate([q.values for q in qtensors], axis=dim)
        return QuantTensor(vals, qtensors[0].scale, qtensors[0].zero_point)


class Quantizer:
    def __call__(self, x):
        q = _elementwise_call(_quantize_kernel, jnp.int8, x)
        return QuantTensor(q, Q_SCALE, Q_ZP)


class DeQuantize:
    def __call__(self, qx):
        return _elementwise_call(_dequantize_kernel, jnp.float32, qx.values)


# ----------------------------------------------------------------------------
# The Wrapper (mirrors the PyTorch dispatch semantics)
# ----------------------------------------------------------------------------
class Wrapper:
    def __init__(self, name):
        self.name = name
        self.gpu_module = None
        self.cpu_module = None
        self.quant_module = None
        self.dequant_module = DeQuantize()
        self.quantizer = None
        self.floatfunc_pre_hook = OrderedDict()
        self.floatfunc_hook = OrderedDict()
        self.resource = 1  # set externally, like in the original code

    # TODO(synk): copy.deepcopy of stateful torch modules has no meaning here;
    # parameters are immutable jnp arrays, so we just store references.
    def setGPUModule(self, mod):
        self.gpu_module = mod

    def setCPUModule(self, mod):
        self.cpu_module = mod

    def setQuantModule(self, mod):
        self.quant_module = mod

    def setQuantizer(self, quant):
        self.quantizer = quant

    def register_floatfunc_pre_hook(self, hook):
        handle = len(self.floatfunc_pre_hook)
        self.floatfunc_pre_hook[handle] = hook
        return handle

    def register_floatfunc_hook(self, hook):
        handle = len(self.floatfunc_hook)
        self.floatfunc_hook[handle] = hook
        return handle

    # ---- float-functional add ------------------------------------------------
    def _add(self, x, y):
        # TODO(synk): .cuda()/.cpu() device moves have no TPU equivalent; the
        # dtype-driven (de)quantization is reproduced (fused into the add
        # kernels), the moves are no-ops.
        if self.resource == 0:
            # float operands are fake-quantized inside the fused q-add kernel
            # (math-identical to quantizer(x/y) -> quant_module.add).
            return self.quant_module.add(x, y)
        if self.resource == 2 or self.resource == 3:
            # quantized operands are dequantized inside the fused float add.
            return self.gpu_module.add(x, y)
        if self.resource == 1:
            return self.cpu_module.add(x, y)

    def add(self, x, y):
        for hook in self.floatfunc_pre_hook.values():
            hook(self, x)
        result = self._add(x, y)
        for hook in self.floatfunc_hook.values():
            hook(self, x, result)
        return result

    # ---- float-functional cat ------------------------------------------------
    def _cat(self, x, dim=0):
        new_x = tuple()
        if self.resource == 0:
            for tk in x:
                if not _is_quant(tk):
                    tk = self.quantizer(tk)
                new_x += (tk,)
            return self.quant_module.cat(new_x, dim)
        if self.resource == 2 or self.resource == 3:
            for tk in x:
                if _is_quant(tk):
                    tk = self.dequant_module(tk)
                new_x += (tk,)
            return self.gpu_module.cat(new_x, dim)
        if self.resource == 1:
            for tk in x:
                if _is_quant(tk):
                    tk = self.dequant_module(tk)
                new_x += (tk,)
            return self.cpu_module.cat(new_x, dim)

    def cat(self, x, dim=0):
        for hook in self.floatfunc_pre_hook.values():
            hook(self, x)
        result = self._cat(x, dim)
        for hook in self.floatfunc_hook.values():
            hook(self, x, result)
        return result

    # ---- forward dispatch ------------------------------------------------------
    def forward(self, inp):
        resource = self.resource
        # TODO(synk): .cuda()/.cpu() placement moves are no-ops on a single TPU.
        if resource == 0:
            # require_quant: float inputs are fake-quantized inside the fused
            # q-conv kernel (math-identical to quantizer -> quant_module, one
            # less HBM round trip).
            return self.quant_module(inp)
        elif resource == 1:
            return self.cpu_module(inp)
        elif resource == 2:
            # require_dequant: quantized inputs are dequantized inside the
            # fused float-conv kernel (math-identical to dequant -> gpu_module).
            return self.gpu_module(inp)
        else:
            # Original used a truthy `assert 'Wrong Config'` that never fires.
            raise AssertionError("Wrong Config")

    __call__ = forward


# ----------------------------------------------------------------------------
# main
# ----------------------------------------------------------------------------
if __name__ == "__main__":
    key = jax.random.PRNGKey(0)
    k1, k2, k3, k4 = jax.random.split(key, 4)

    # NHWC (channel-last) activations: conv rows view is a free reshape and the
    # conv output lane axis is the 128-wide channel dim (lane-dense stores).
    N, H, W, C = 2, 16, 16, 128
    x = jax.random.normal(k1, (N, H, W, C), jnp.float32)
    y = jax.random.normal(k2, (N, H, W, C), jnp.float32)

    # deterministic 1x1-conv parameters for the wrapped modules
    weight = 0.1 * jax.random.normal(k3, (C, C), jnp.float32)   # (Cin, Cout)
    bias = 0.05 * jax.random.normal(k4, (1, C), jnp.float32)

    float_mod = FloatConv1x1Module(weight, bias)
    quant_mod = QuantConv1x1Module(weight, bias)

    wrapper = Wrapper("lala")
    wrapper.setGPUModule(float_mod)
    wrapper.setCPUModule(float_mod)
    wrapper.setQuantModule(quant_mod)
    wrapper.setQuantizer(Quantizer())

    calls = {"pre": 0, "post": 0}
    wrapper.register_floatfunc_pre_hook(
        lambda m, a: calls.__setitem__("pre", calls["pre"] + 1))
    wrapper.register_floatfunc_hook(
        lambda m, a, r: calls.__setitem__("post", calls["post"] + 1))

    # resource == 2 : "GPU" float path (tiled Pallas 1x1-conv matmul)
    wrapper.resource = 2
    out_gpu = wrapper(x)
    # resource == 1 : "CPU" float path (same Pallas kernel)
    wrapper.resource = 1
    out_cpu = wrapper(x)
    # resource == 0 : quantized path (fused fake-quant + conv + requant)
    wrapper.resource = 0
    out_q = wrapper(x)
    # resource == 2 with a quantized input: fused dequant + float conv
    qx = wrapper.quantizer(x)
    wrapper.resource = 2
    out_dq = wrapper(qx)
    # float-functional add / cat on the "GPU" path
    out_add = wrapper.add(x, y)
    out_cat = wrapper.cat((x, y), dim=-1)
    # quantized add / cat
    wrapper.resource = 0
    out_qadd = wrapper.add(x, y)
    out_qcat = wrapper.cat((x, y), dim=-1)

    jax.block_until_ready((out_gpu, out_cpu, out_q.values, out_dq, out_add,
                           out_cat, out_qadd.values, out_qcat.values))

    # -------- correctness checks against pure-JAX references --------
    def fq(v):   # quantize -> dequantize (per-tensor qint8, scale Q_SCALE)
        return jnp.clip(jnp.round(v / Q_SCALE), QMIN, QMAX) * Q_SCALE

    def rq(v):   # requantize to the output scale
        return jnp.clip(jnp.round(v / QOUT_SCALE), QMIN, QMAX).astype(jnp.int8)

    ref_conv = jnp.einsum("nhwc,co->nhwo", x, weight) + bias[0]
    assert jnp.allclose(out_gpu, ref_conv, atol=1e-4), "float conv mismatch (gpu)"
    assert jnp.allclose(out_cpu, ref_conv, atol=1e-4), "float conv mismatch (cpu)"

    ref_dq_conv = jnp.einsum("nhwc,co->nhwo", fq(x), weight) + bias[0]
    assert jnp.allclose(out_dq, ref_dq_conv, atol=1e-3), "dequant conv mismatch"

    ref_q = rq(ref_dq_conv)
    assert out_q.values.dtype == jnp.int8 and out_q.values.shape == (N, H, W, C)
    assert int(jnp.max(jnp.abs(out_q.values.astype(jnp.int32)
                               - ref_q.astype(jnp.int32)))) <= 1, "q-conv mismatch"

    assert jnp.allclose(out_add, x + y, atol=1e-6), "float add mismatch"

    ref_qadd = rq(fq(x) + fq(y))
    assert int(jnp.max(jnp.abs(out_qadd.values.astype(jnp.int32)
                               - ref_qadd.astype(jnp.int32)))) <= 1, "q-add mismatch"

    assert out_cat.shape == (N, H, W, 2 * C)
    assert jnp.allclose(out_cat, jnp.concatenate([x, y], axis=-1)), "cat mismatch"

    ref_qcat = jnp.concatenate(
        [jnp.clip(jnp.round(x / Q_SCALE), QMIN, QMAX).astype(jnp.int8),
         jnp.clip(jnp.round(y / Q_SCALE), QMIN, QMAX).astype(jnp.int8)], axis=-1)
    assert out_qcat.values.shape == (N, H, W, 2 * C)
    assert int(jnp.max(jnp.abs(out_qcat.values.astype(jnp.int32)
                               - ref_qcat.astype(jnp.int32)))) <= 1, "q-cat mismatch"

    assert calls["pre"] >= 1 and calls["post"] >= 1

    print("KERNEL_OK")
</pallas_src>

<mosaic_0001>
module attributes {stable_mosaic.version = 11 : i64} {
  func.func @kernel(%arg0: i32, %arg1: memref<256x128xf32, #tpu.memory_space<vmem>>, %arg2: memref<128x128xf32, #tpu.memory_space<vmem>>, %arg3: memref<1x128xf32, #tpu.memory_space<vmem>>, %arg4: memref<256x128xf32, #tpu.memory_space<vmem>>) attributes {dimension_semantics = [#tpu.dimension_semantics<parallel>], iteration_bounds = array<i64: 2>, scalar_prefetch = 0 : i64, scratch_operands = 0 : i64, tpu.core_type = #tpu.core_type<tc>, window_params = [{transform_indices = @transform_0, window_bounds = array<i64: 256, 128>}, {pipeline_mode = #tpu.pipeline_mode<synchronous>, transform_indices = @transform_1, window_bounds = array<i64: 128, 128>}, {pipeline_mode = #tpu.pipeline_mode<synchronous>, transform_indices = @transform_2, window_bounds = array<i64: 1, 128>}, {transform_indices = @transform_3, window_bounds = array<i64: 256, 128>}]} {
    %c0 = arith.constant 0 : index
    %c0_0 = arith.constant 0 : index
    %0 = vector.load %arg1[%c0, %c0_0] : memref<256x128xf32, #tpu.memory_space<vmem>>, vector<256x128xf32>
    %c0_1 = arith.constant 0 : index
    %c0_2 = arith.constant 0 : index
    %1 = vector.load %arg2[%c0_1, %c0_2] : memref<128x128xf32, #tpu.memory_space<vmem>>, vector<128x128xf32>
    %cst = arith.constant dense<0.000000e+00> : vector<256x128xf32>
    %2 = tpu.matmul %0, %1, %cst {dimension_numbers = #tpu.dot_dimension_numbers<[1], [0], [0], [1], [0, 0, 1, 1], [], []>} : vector<256x128xf32>, vector<128x128xf32>, vector<256x128xf32> -> vector<256x128xf32>
    %c0_3 = arith.constant 0 : index
    %c0_4 = arith.constant 0 : index
    %3 = vector.load %arg3[%c0_3, %c0_4] : memref<1x128xf32, #tpu.memory_space<vmem>>, vector<1x128xf32>
    %4 = vector.broadcast %3 : vector<1x128xf32> to vector<256x128xf32>
    %5 = arith.addf %2, %4 : vector<256x128xf32>
    %c0_5 = arith.constant 0 : index
    %c0_6 = arith.constant 0 : index
    %6 = vector.load %arg4[%c0_5, %c0_6] : memref<256x128xf32, #tpu.memory_space<vmem>>, vector<256x128xf32>
    tpu.vector_store %arg4[%c0_5, %c0_6], %5 {strides = array<i32>} : memref<256x128xf32, #tpu.memory_space<vmem>>, vector<256x128xf32>,
    return
  }
  func.func @transform_0(%arg0: i32) -> (i32, i32) {
    %c0_i32 = arith.constant 0 : i32
    %c0_i32_0 = arith.constant 0 : i32
    return %arg0, %c0_i32 : i32, i32
  }
  func.func @transform_1(%arg0: i32) -> (i32, i32) {
    %c0_i32 = arith.constant 0 : i32
    %c0_i32_0 = arith.constant 0 : i32
    %c0_i32_1 = arith.constant 0 : i32
    return %c0_i32, %c0_i32_0 : i32, i32
  }
  func.func @transform_2(%arg0: i32) -> (i32, i32) {
    %c0_i32 = arith.constant 0 : i32
    %c0_i32_0 = arith.constant 0 : i32
    %c0_i32_1 = arith.constant 0 : i32
    return %c0_i32, %c0_i32_0 : i32, i32
  }
  func.func @transform_3(%arg0: i32) -> (i32, i32) {
    %c0_i32 = arith.constant 0 : i32
    %c0_i32_0 = arith.constant 0 : i32
    return %arg0, %c0_i32 : i32, i32
  }
}

</mosaic_0001>

<bundles_post_ra>
// kernel: tpu_custom_call.1
= control target key start
LH: loop header
LB: loop body
LE: loop exit
PB: predicated region body
PF: predicated region fallthrough
CT: control target
= control target key end

     0   :  { %8 = vsyncpa [#allocation3], 0  ;;  %s1345_s0 = inlined_call_operand.hbm [shape: f32[512,128], index: 0, kind: input, shape index: {}]   ;;  %s1346_s1 = inlined_call_operand.hbm [shape: f32[128,128], index: 1, kind: input, shape index: {}]   ;;  %s1347_s2 = inlined_call_operand.vmem [shape: f32[1,128], index: 2, kind: input, shape index: {}]   ;;  %s1348_s3 = inlined_call_operand.hbm [shape: f32[512,128], index: 3, kind: output, shape index: {}]  }
   0x1   :  { %10 = vsyncpa [#allocation3 + $0x1], 0 }
   0x2   :  { %11 = vsyncpa [#allocation6], 0 }
   0x3   :  { %12 = vsyncpa [#allocation4], 0 }
   0x4   :  { %14 = vsyncpa [#allocation4 + $0x1], 0  ;;  %s1028_s12 = smov 0   ;;  %s1030_s13 = smov 0  }
   0x5   :  { %s1032_s14 = smov 0   ;;  %s1034_s15 = smov 0  }
   0x6 LB: > { %s1049_s16 = sadd.s32 4294967295, %s999_s15   ;;  %s615_s17 = sadd.s32 4294967294, %s999_s15   ;;  %s999_s15 = sphi %s1034_s15, %s1368_s15   ;;  %s995_s14 = sphi %s1032_s14, %s1367_s14   ;;  %s991_s13 = sphi %s1030_s13, %s1366_s13   ;;  %s987_s12 = sphi %s1028_s12, %s1365_s12  }
   0x7   : > { %p40_p0 = scmp.ne.s32.totalorder %s991_s13, %s987_s12  ;;  %p1349_p1 = scmp.eq.s32.totalorder %s1049_s16, 0 }
   0x8   : > { %p112_p3 = scmp.eq.s32.totalorder %s615_s17, 1  ;;  %p616_p5 = scmp.ge.s32.totalorder %s999_s15, 1 }
   0x9   : > { %p1058_p4 = por %p1349_p1, %p40_p0  ;;  %p119_p7 = scmp.lt.s32.totalorder %s999_s15, 3 }
   0xa   : > { %p1063_p6 = por %p112_p3, %p40_p0  ;;  %s1001_s21 = smov [#allocation5]  }
   0xb   : > { %s1352_s18 = scalar_select %p1058_p4, 1, 0 }
   0xc   : > { %s1353_s19 = scalar_select %p1063_p6, 1, 0 }
   0xd   : > { %p1068_p8 = pnand %p616_p5, %p119_p7  ;;  %s131_s22 = sshll.u32 %s1001_s21, 4  ;;  %s1072_s22 = int_to_ptr.vmem [resolvable:$true] %s131_s22 }
   0xe   : > { %s1084_s24 = sadd.s32 1, %s999_s15   ;;  %s27_s25 = sadd.s32 1, %s995_s14 }
   0xf   : > { %s1354_s20 = scalar_select %p1068_p8, 1, 0 }
  0x10   : > { %p818_p9 = pneg %p1068_p8  ;;  %s24_s26 = ssub.s32 %s999_s15, %s1084_s24 }
  0x11   : > { %s871_s29 = scalar_lea.hbm %s1346_s1, 2048 }
  0x12   : > { %p1079_p11 = pnand %p818_p9, %p1349_p1  ;;  %p872_p12 = scmp.ne.s32.totalorder %s1346_s1, %s871_s29 }
  0x13   : > { %p878_p5 = scmp.lt.u32.totalorder %s871_s29, %s1346_s1 }
  0x14   : > { %p873_p13 = pneg %p1079_p11 }
  0x16   : > { %p874_p0 = pnand %p873_p13, %p872_p12 }
  0x18   : > { %p875_p3 = pneg %p874_p0 }
  0x1a   : > { %p880_p7 = pnand %p878_p5, %p875_p3 }
  0x1c   : > { %883 = shalt.err (!%p880_p7)
}
  0x1d   : > { %s884_s7 = scalar_lea.vmem %s1072_s22, 2048  ;;  %p892_p2 = scmp.lt.s32.totalorder %s1072_s22, %s1072_s22 }
  0x1e   : > { %p885_p9 = scmp.ne.s32.totalorder %s1072_s22, %s884_s7  ;;  %p893_p6 = scmp.lt.s32.totalorder %s884_s7, %s884_s7 }
  0x20   : > { %p887_p10 = pnand %p885_p9, %p873_p13  ;;  %p894_p4 = por %p893_p6, %p892_p2 }
  0x22   : > { %p888_p1 = pneg %p887_p10 }
  0x24   : > { %p895_p8 = pnand %p894_p4, %p888_p1 }
  0x26   : > { %898 = shalt.err (!%p895_p8)
}
  0x27   : > { %s1002_s8 = smov 128   ;;  %s1003_s9 = smov 8  }
  0x28   : > { %821 = dma.hbm_to_vmem [thread:$0]  (!%p1079_p11), %s1346_s1, 2048, %s1072_s22, [#allocation6], %s1002_s8, %s1002_s8, %s1003_s9  }
  0x29   : > { %p25_p1 = scmp.eq.s32.totalorder %s24_s26, 0  ;;  %p34_p2 = scmp.ne.s32.totalorder %s995_s14, %s991_s13 }
  0x2a   : > { %p35_p4 = scmp.eq.s32.totalorder %s999_s15, 0  ;;  %p831_p6 = scmp.lt.s32.totalorder %s999_s15, 2 }
  0x2b   : > { %s1118_s17 = scalar_select %p25_p1, %s995_s14, %s27_s25  }
  0x2c   : > { %p36_p8 = por %p35_p4, %p34_p2  ;;  %p1356_p10 = scmp.eq.s32.totalorder %s1049_s16, 1 }
  0x2d   : > { %s148_s23 = sand.u32 1, %s995_s14   ;;  %s632_s27 = sshll.u32 %s999_s15, 12 }
  0x2e   : > { %p1122_p12 = por %p1356_p10, %p34_p2  ;;  %s619_s28 = sshll.u32 %s148_s23, 8 }
  0x2f   : > { %s1131_s4 = scalar_lea.hbm %s1345_s0, %s632_s27  ;;  %s152_s22 = scalar_lea.vmem [#allocation2], %s619_s28 }
  0x30   : > { %s159_s25 = sshll.u32 %s152_s22, 4  ;;  %p1133_p11 = pnand %p831_p6, %p36_p8  ;;  %s1137_s25 = int_to_ptr.vmem [resolvable:$true] %s159_s25 }
  0x31   : > { %s1139_s5 = scalar_lea.sflag [#allocation3], %s148_s23  ;;  %s899_s6 = scalar_lea.hbm %s1131_s4, 4096 }
  0x32   : > { %p900_p13 = scmp.ne.s32.totalorder %s1131_s4, %s899_s6  ;;  %p901_p0 = pneg %p1133_p11 }
  0x33   : > { %s904_s11 = scalar_lea.hbm %s1345_s0, 8192  ;;  %p905_p7 = scmp.lt.u32.totalorder %s1131_s4, %s1345_s0 }
  0x34   : > { %p902_p3 = pnand %p901_p0, %p900_p13  ;;  %p906_p9 = scmp.lt.u32.totalorder %s904_s11, %s899_s6 }
  0x35   : > { %p908_p2 = scmp.lt.u32.totalorder %s899_s6, %s1131_s4 }
  0x36   : > { %p903_p5 = pneg %p902_p3  ;;  %p907_p1 = por %p906_p9, %p905_p7 }
  0x38   : > { %p909_p4 = por %p908_p2, %p907_p1 }
  0x3a   : > { %p910_p6 = pnand %p909_p4, %p903_p5 }
  0x3c   : > { %913 = shalt.err (!%p910_p6)
}
  0x3d   : > { %s914_s23 = scalar_lea.vmem %s1137_s25, 4096  ;;  %s1004_s29 = smov [#allocation2]  }
  0x3e   : > { %p915_p8 = scmp.ne.s32.totalorder %s1137_s25, %s914_s23  ;;  %s919_s30 = sshll.u32 %s1004_s29, 4  ;;  %s920_s30 = int_to_ptr.vmem [resolvable:$false] %s919_s30 }
  0x3f   : > { %s921_s22 = scalar_lea.vmem %s920_s30, 8192  ;;  %p922_p3 = scmp.lt.s32.totalorder %s1137_s25, %s920_s30 }
  0x40   : > { %p917_p10 = pnand %p915_p8, %p901_p0  ;;  %p923_p7 = scmp.lt.s32.totalorder %s921_s22, %s914_s23 }
  0x42   : > { %p918_p13 = pneg %p917_p10  ;;  %p924_p9 = por %p923_p7, %p922_p3 }
  0x44   : > { %p925_p1 = pnand %p924_p9, %p918_p13 }
  0x46   : > { %928 = shalt.err (!%p925_p1)
}
  0x47   : > { %825 = dma.hbm_to_vmem [thread:$0]  (!%p1133_p11), %s1131_s4, 4096, %s1137_s25, %s1139_s5, %s1002_s8, %s1002_s8, %s1003_s9  }
  0x48   : > { %p1359_p0 = scmp.ne.s32.totalorder %s1354_s20, 0 }
  0x49   : > { %s1173_s6 = sand.u32 (!%p1359_p0), 1, %s991_s13   ;;  %p1360_p5 = scmp.ne.s32.totalorder (!%p1359_p0), %s1352_s18, 0 }
  0x4a   : > { %171 = sbr.rel (%p1359_p0) target bundleno = 378 (0x17a), region = 32  ;;  %s623_s7 = sshll.u32 (!%p1359_p0), %s1173_s6, 8 }
  0x4b   : > { %s174_s10 = scalar_lea.sflag (!%p1359_p0), [#allocation3], %s1173_s6  ;;  %s1179_s26 = scalar_lea.vmem (!%p1359_p0), [#allocation2], %s623_s7 }
  0x51   : > { %974 = dma.done.wait (%p1360_p5), %s174_s10, 4096  }
  0x52   : > { %976 = vsyncadd (%p1360_p5), %s174_s10, 4294963200  ;;  %p1361_p11 = scmp.eq.s32.totalorder %s1049_s16, 0 }
  0x54   : > { %978 = dma.done.wait (%p1361_p11), [#allocation6], 2048   ;;  %p1362_p2 = pmov %p1361_p11 }
  0x55   : > { %v238_v0 = vld [vmem:[#allocation5] sm:$0xff]  ;;  %v239_v1 = vld [vmem:[#allocation5 + $0x8] sm:$0xff]  ;;  %v240_v2 = vld [vmem:[#allocation5 + $0x10] sm:$0xff]  ;;  %s1232_s8 = scalar_lea.vmem [#allocation7], %s623_s7  ;;  %s633_s9 = sshll.u32 %s1049_s16, 12 }
  0x56   : > { %980 = vsyncadd (%p1362_p2), [#allocation6], 4294965248  ;;  %v762_v3 = vpack.c.bf16 %v239_v1, %v238_v0  ;;  %v241_v4 = vld [vmem:[#allocation5 + $0x18] sm:$0xff]  ;;  %v242_v6 = vld [vmem:[#allocation5 + $0x20] sm:$0xff]  ;;  %s532_s4 = sshll.u32 %s1232_s8, 4  ;;  %s1293_s5 = scalar_lea.hbm %s1348_s3, %s633_s9  ;;  %s1295_s4 = int_to_ptr.vmem [resolvable:$true] %s532_s4 }
  0x57   : > { %v766_v5 = vpack.c.bf16 %v241_v4, %v240_v2  ;;  %v243_v7 = vld [vmem:[#allocation5 + $0x28] sm:$0xff]  ;;  %v206_v9 = vld [vmem:[%s1179_s26] sm:$0xff]  ;;  %v244_v11 = vld [vmem:[#allocation5 + $0x30] sm:$0xff]  ;;  %s519_s11 = scalar_lea.sflag [#allocation4], %s1173_s6  ;;  %s929_s27 = scalar_lea.vmem %s1295_s4, 4096 }
  0x58   : > { %763 = vmatprep.subr.bf16.mxu0 %v762_v3  ;;  %794 = vmatprep.subr.bf16.mxu1 %v762_v3  ;;  %v770_v8 = vpack.c.bf16 %v243_v7, %v242_v6  ;;  %v222_v10 = vld [vmem:[%s1179_s26 + $0x80] sm:$0xff]  ;;  %v245_v12 = vld [vmem:[#allocation5 + $0x38] sm:$0xff]  ;;  %v247_v15 = vld [vmem:[#allocation5 + $0x48] sm:$0xff]  ;;  %p930_p4 = scmp.ne.s32.totalorder %s1295_s4, %s929_s27  ;;  %s1005_s28 = smov [#allocation7]  }
  0x59   : > { %765 = vmatpush3.bf16.msra.mxu0 %v762_v3  ;;  %802 = vmatpush3.bf16.msra.mxu1 %v762_v3  ;;  %v774_v13 = vpack.c.bf16 %v245_v12, %v244_v11  ;;  %v246_v14 = vld [vmem:[#allocation5 + $0x40] sm:$0xff]  ;;  %v248_v17 = vld [vmem:[#allocation5 + $0x50] sm:$0xff]  ;;  %v249_v18 = vld [vmem:[#allocation5 + $0x58] sm:$0xff]  ;;  %s933_s23 = sshll.u32 %s1005_s28, 4  ;;  %s934_s23 = int_to_ptr.vmem [resolvable:$false] %s933_s23 }
  0x5a   : > { %767 = vmatprep.subr.bf16.mxu0 %v766_v5  ;;  %795 = vmatprep.subr.bf16.mxu1 %v766_v5  ;;  %v778_v16 = vpack.c.bf16 %v247_v15, %v246_v14  ;;  %v782_v19 = vpack.c.bf16 %v249_v18, %v248_v17  ;;  %v250_v20 = vld [vmem:[#allocation5 + $0x60] sm:$0xff]  ;;  %v251_v21 = vld [vmem:[#allocation5 + $0x68] sm:$0xff]  ;;  %v252_v23 = vld [vmem:[#allocation5 + $0x70] sm:$0xff]  ;;  %p931_p6 = pnand %p930_p4, %p1122_p12  ;;  %s935_s29 = scalar_lea.vmem %s934_s23, 8192 }
  0x5b   : > { %714 = vmatprep.mubr.f32.mxu0 %v206_v9  ;;  %738 = vmatprep.mubr.f32.mxu1 %v222_v10  ;;  %v786_v22 = vpack.c.bf16 %v251_v21, %v250_v20  ;;  %v253_v24 = vld [vmem:[#allocation5 + $0x78] sm:$0xff]  ;;  %v207_v26 = vld [vmem:[%s1179_s26 + $0x8] sm:$0xff]  ;;  %v208_v28 = vld [vmem:[%s1179_s26 + $0x10] sm:$0xff]  ;;  %p936_p10 = scmp.lt.s32.totalorder %s1295_s4, %s934_s23  ;;  %p937_p13 = scmp.lt.s32.totalorder %s935_s29, %s929_s27 }
  0x5c   : > { %v790_v25 = vpack.c.bf16 %v253_v24, %v252_v23  ;;  %v223_v27 = vld [vmem:[%s1179_s26 + $0x88] sm:$0xff]  ;;  %v224_v29 = vld [vmem:[%s1179_s26 + $0x90] sm:$0xff]  ;;  %v209_v30 = vld [vmem:[%s1179_s26 + $0x18] sm:$0xff]  ;;  %p932_p8 = pneg %p931_p6 }
  0x5d   : > { %769 = vmatpush3.bf16.msra.mxu0 %v766_v5  ;;  %803 = vmatpush3.bf16.msra.mxu1 %v766_v5  ;;  %v225_v31 = vld [vmem:[%s1179_s26 + $0x98] sm:$0xff]  ;;  %v210_v32 = vld [vmem:[%s1179_s26 + $0x20] sm:$0xff]  ;;  %v211_v34 = vld [vmem:[%s1179_s26 + $0x28] sm:$0xff]  ;;  %p938_p3 = por %p937_p13, %p936_p10 }
  0x5e   : > { %771 = vmatprep.subr.bf16.mxu0 %v770_v8  ;;  %796 = vmatprep.subr.bf16.mxu1 %v770_v8  ;;  %v226_v33 = vld [vmem:[%s1179_s26 + $0xa0] sm:$0xff]  ;;  %v227_v35 = vld [vmem:[%s1179_s26 + $0xa8] sm:$0xff]  ;;  %v212_v36 = vld [vmem:[%s1179_s26 + $0x30] sm:$0xff] }
  0x5f   : > { %v228_v37 = vld [vmem:[%s1179_s26 + $0xb0] sm:$0xff]  ;;  %v213_v38 = vld [vmem:[%s1179_s26 + $0x38] sm:$0xff]  ;;  %v214_v40 = vld [vmem:[%s1179_s26 + $0x40] sm:$0xff]  ;;  %p939_p7 = pnand %p938_p3, %p932_p8 }
  0x60   : > { %v229_v39 = vld [vmem:[%s1179_s26 + $0xb8] sm:$0xff]  ;;  %v230_v41 = vld [vmem:[%s1179_s26 + $0xc0] sm:$0xff]  ;;  %v215_v42 = vld [vmem:[%s1179_s26 + $0x48] sm:$0xff] }
  0x61   : > { %773 = vmatpush3.bf16.msra.mxu0 %v770_v8  ;;  %804 = vmatpush3.bf16.msra.mxu1 %v770_v8  ;;  %v231_v43 = vld [vmem:[%s1179_s26 + $0xc8] sm:$0xff]  ;;  %v216_v44 = vld [vmem:[%s1179_s26 + $0x50] sm:$0xff]  ;;  %v217_v46 = vld [vmem:[%s1179_s26 + $0x58] sm:$0xff] }
  0x62   : > { %775 = vmatprep.subr.bf16.mxu0 %v774_v13  ;;  %797 = vmatprep.subr.bf16.mxu1 %v774_v13  ;;  %v232_v45 = vld [vmem:[%s1179_s26 + $0xd0] sm:$0xff]  ;;  %v233_v47 = vld [vmem:[%s1179_s26 + $0xd8] sm:$0xff]  ;;  %v218_v48 = vld [vmem:[%s1179_s26 + $0x60] sm:$0xff] }
  0x63   : > { %v234_v49 = vld [vmem:[%s1179_s26 + $0xe0] sm:$0xff]  ;;  %v219_v50 = vld [vmem:[%s1179_s26 + $0x68] sm:$0xff]  ;;  %v220_v52 = vld [vmem:[%s1179_s26 + $0x70] sm:$0xff] }
  0x64   : > { %v235_v51 = vld [vmem:[%s1179_s26 + $0xe8] sm:$0xff]  ;;  %v236_v53 = vld [vmem:[%s1179_s26 + $0xf0] sm:$0xff]  ;;  %v221_v54 = vld [vmem:[%s1179_s26 + $0x78] sm:$0xff] }
  0x65   : > { %777 = vmatpush3.bf16.msra.mxu0 %v774_v13  ;;  %805 = vmatpush3.bf16.msra.mxu1 %v774_v13  ;;  %v237_v55 = vld [vmem:[%s1179_s26 + $0xf8] sm:$0xff]  ;;  %v1224_v56 = vld [vmem:[%s1347_s2] ss:$0 sm:$0xff] }
  0x66   : > { %779 = vmatprep.subr.bf16.mxu0 %v778_v16  ;;  %798 = vmatprep.subr.bf16.mxu1 %v778_v16 }
  0x69   : > { %781 = vmatpush3.bf16.msra.mxu0 %v778_v16  ;;  %806 = vmatpush3.bf16.msra.mxu1 %v778_v16 }
  0x6a   : > { %783 = vmatprep.subr.bf16.mxu0 %v782_v19  ;;  %799 = vmatprep.subr.bf16.mxu1 %v782_v19 }
  0x6d   : > { %785 = vmatpush3.bf16.msra.mxu0 %v782_v19  ;;  %807 = vmatpush3.bf16.msra.mxu1 %v782_v19 }
  0x6e   : > { %787 = vmatprep.subr.bf16.mxu0 %v786_v22  ;;  %800 = vmatprep.subr.bf16.mxu1 %v786_v22 }
  0x71   : > { %789 = vmatpush3.bf16.msra.mxu0 %v786_v22  ;;  %808 = vmatpush3.bf16.msra.mxu1 %v786_v22 }
  0x72   : > { %791 = vmatprep.subr.bf16.mxu0 %v790_v25  ;;  %801 = vmatprep.subr.bf16.mxu1 %v790_v25 }
  0x75   : > { %793 = vmatpush3.bf16.msra.mxu0 %v790_v25  ;;  %809 = vmatpush3.bf16.msra.mxu1 %v790_v25 }
  0x78   : > { %715 = vmatmul.mubr.f32.vlgmr.msra.gmra.mrb[0].mxu0 %v207_v26  ;;  %739 = vmatmul.mubr.f32.vlgmr.msra.gmra.mrb[0].mxu1 %v223_v27 }
  0x79   : > { %717 = vmatprep.mubr.f32.mxu0 %v208_v28  ;;  %741 = vmatprep.mubr.f32.mxu1 %v224_v29 }
  0x7c   : > { %718 = vmatmul.mubr.f32.gmra.mrb[2].mxu0 %v209_v30  ;;  %742 = vmatmul.mubr.f32.gmra.mrb[2].mxu1 %v225_v31 }
  0x7d   : > { %720 = vmatprep.mubr.f32.mxu0 %v210_v32  ;;  %744 = vmatprep.mubr.f32.mxu1 %v226_v33 }
  0x80   : > { %721 = vmatmul.mubr.f32.gmra.mrb[4].mxu0 %v211_v34  ;;  %745 = vmatmul.mubr.f32.gmra.mrb[4].mxu1 %v227_v35 }
  0x81   : > { %723 = vmatprep.mubr.f32.mxu0 %v212_v36  ;;  %747 = vmatprep.mubr.f32.mxu1 %v228_v37 }
  0x84   : > { %724 = vmatmul.mubr.f32.gmra.mrb[6].mxu0 %v213_v38  ;;  %748 = vmatmul.mubr.f32.gmra.mrb[6].mxu1 %v229_v39 }
  0x85   : > { %726 = vmatprep.mubr.f32.mxu0 %v214_v40  ;;  %750 = vmatprep.mubr.f32.mxu1 %v230_v41 }
  0x88   : > { %727 = vmatmul.mubr.f32.gmra.mrb[8].mxu0 %v215_v42  ;;  %751 = vmatmul.mubr.f32.gmra.mrb[8].mxu1 %v231_v43 }
  0x89   : > { %729 = vmatprep.mubr.f32.mxu0 %v216_v44  ;;  %753 = vmatprep.mubr.f32.mxu1 %v232_v45 }
  0x8c   : > { %730 = vmatmul.mubr.f32.gmra.mrb[10].mxu0 %v217_v46  ;;  %754 = vmatmul.mubr.f32.gmra.mrb[10].mxu1 %v233_v47 }
  0x8d   : > { %732 = vmatprep.mubr.f32.mxu0 %v218_v48  ;;  %756 = vmatprep.mubr.f32.mxu1 %v234_v49 }
  0x90   : > { %733 = vmatmul.mubr.f32.gmra.mrb[12].mxu0 %v219_v50  ;;  %757 = vmatmul.mubr.f32.gmra.mrb[12].mxu1 %v235_v51 }
  0x91   : > { %735 = vmatprep.mubr.f32.mxu0 %v220_v52  ;;  %759 = vmatprep.mubr.f32.mxu1 %v236_v53 }
  0x94   : > { %736 = vmatmul.mubr.f32.gmra.mrb[14].mxu0 %v221_v54  ;;  %760 = vmatmul.mubr.f32.gmra.mrb[14].mxu1 %v237_v55 }
 0x14b   : > { %v716_v57 = vpop.f32.mrb[0].mxu0  ;;  %v740_v58 = vpop.f32.mrb[0].mxu1 }
 0x14c   : > { %v333_v59 = vadd.f32 %v716_v57, %v1224_v56  ;;  %v413_v60 = vadd.f32 %v740_v58, %v1224_v56  ;;  %v327_v61 = vpop.f32.mrb[1].mxu0  ;;  %v407_v62 = vpop.f32.mrb[1].mxu1 }
 0x14d   : > { %v328_v63 = vadd.f32 %v1224_v56, %v327_v61  ;;  %v408_v0 = vadd.f32 %v1224_v56, %v407_v62 }
 0x14e   : > { %487 = vst [vmem:[%s1232_s8 + $0x8] sm:$0xff] %v333_v59  ;;  %503 = vst [vmem:[%s1232_s8 + $0x88] sm:$0xff] %v413_v60 }
 0x14f   : > { %486 = vst [vmem:[%s1232_s8] sm:$0xff] %v328_v63  ;;  %502 = vst [vmem:[%s1232_s8 + $0x80] sm:$0xff] %v408_v0  ;;  %v719_v1 = vpop.f32.mrb[2].mxu0  ;;  %v743_v2 = vpop.f32.mrb[2].mxu1 }
 0x150   : > { %v343_v3 = vadd.f32 %v719_v1, %v1224_v56  ;;  %v423_v4 = vadd.f32 %v743_v2, %v1224_v56  ;;  %v337_v5 = vpop.f32.mrb[3].mxu0  ;;  %v417_v6 = vpop.f32.mrb[3].mxu1 }
 0x151   : > { %v338_v7 = vadd.f32 %v1224_v56, %v337_v5  ;;  %v418_v8 = vadd.f32 %v1224_v56, %v417_v6 }
 0x152   : > { %489 = vst [vmem:[%s1232_s8 + $0x18] sm:$0xff] %v343_v3  ;;  %505 = vst [vmem:[%s1232_s8 + $0x98] sm:$0xff] %v423_v4 }
 0x153   : > { %488 = vst [vmem:[%s1232_s8 + $0x10] sm:$0xff] %v338_v7  ;;  %504 = vst [vmem:[%s1232_s8 + $0x90] sm:$0xff] %v418_v8  ;;  %v722_v9 = vpop.f32.mrb[4].mxu0  ;;  %v746_v10 = vpop.f32.mrb[4].mxu1 }
 0x154   : > { %v353_v11 = vadd.f32 %v722_v9, %v1224_v56  ;;  %v433_v12 = vadd.f32 %v746_v10, %v1224_v56  ;;  %v347_v13 = vpop.f32.mrb[5].mxu0  ;;  %v427_v14 = vpop.f32.mrb[5].mxu1 }
 0x155   : > { %v348_v15 = vadd.f32 %v1224_v56, %v347_v13  ;;  %v428_v16 = vadd.f32 %v1224_v56, %v427_v14 }
 0x156   : > { %491 = vst [vmem:[%s1232_s8 + $0x28] sm:$0xff] %v353_v11  ;;  %507 = vst [vmem:[%s1232_s8 + $0xa8] sm:$0xff] %v433_v12 }
 0x157   : > { %490 = vst [vmem:[%s1232_s8 + $0x20] sm:$0xff] %v348_v15  ;;  %506 = vst [vmem:[%s1232_s8 + $0xa0] sm:$0xff] %v428_v16  ;;  %v725_v17 = vpop.f32.mrb[6].mxu0  ;;  %v749_v18 = vpop.f32.mrb[6].mxu1 }
 0x158   : > { %v363_v19 = vadd.f32 %v725_v17, %v1224_v56  ;;  %v443_v20 = vadd.f32 %v749_v18, %v1224_v56  ;;  %v357_v21 = vpop.f32.mrb[7].mxu0  ;;  %v437_v22 = vpop.f32.mrb[7].mxu1 }
 0x159   : > { %v358_v23 = vadd.f32 %v1224_v56, %v357_v21  ;;  %v438_v24 = vadd.f32 %v1224_v56, %v437_v22 }
 0x15a   : > { %493 = vst [vmem:[%s1232_s8 + $0x38] sm:$0xff] %v363_v19  ;;  %509 = vst [vmem:[%s1232_s8 + $0xb8] sm:$0xff] %v443_v20 }
 0x15b   : > { %492 = vst [vmem:[%s1232_s8 + $0x30] sm:$0xff] %v358_v23  ;;  %508 = vst [vmem:[%s1232_s8 + $0xb0] sm:$0xff] %v438_v24  ;;  %v728_v25 = vpop.f32.mrb[8].mxu0  ;;  %v752_v26 = vpop.f32.mrb[8].mxu1 }
 0x15c   : > { %v373_v27 = vadd.f32 %v728_v25, %v1224_v56  ;;  %v453_v28 = vadd.f32 %v752_v26, %v1224_v56  ;;  %v367_v29 = vpop.f32.mrb[9].mxu0  ;;  %v447_v30 = vpop.f32.mrb[9].mxu1 }
 0x15d   : > { %v368_v31 = vadd.f32 %v1224_v56, %v367_v29  ;;  %v448_v32 = vadd.f32 %v1224_v56, %v447_v30 }
 0x15e   : > { %495 = vst [vmem:[%s1232_s8 + $0x48] sm:$0xff] %v373_v27  ;;  %511 = vst [vmem:[%s1232_s8 + $0xc8] sm:$0xff] %v453_v28 }
 0x15f   : > { %494 = vst [vmem:[%s1232_s8 + $0x40] sm:$0xff] %v368_v31  ;;  %510 = vst [vmem:[%s1232_s8 + $0xc0] sm:$0xff] %v448_v32  ;;  %v731_v33 = vpop.f32.mrb[10].mxu0  ;;  %v755_v34 = vpop.f32.mrb[10].mxu1 }
 0x160   : > { %v383_v35 = vadd.f32 %v731_v33, %v1224_v56  ;;  %v463_v36 = vadd.f32 %v755_v34, %v1224_v56  ;;  %v377_v37 = vpop.f32.mrb[11].mxu0  ;;  %v457_v38 = vpop.f32.mrb[11].mxu1 }
 0x161   : > { %v378_v39 = vadd.f32 %v1224_v56, %v377_v37  ;;  %v458_v40 = vadd.f32 %v1224_v56, %v457_v38 }
 0x162   : > { %497 = vst [vmem:[%s1232_s8 + $0x58] sm:$0xff] %v383_v35  ;;  %513 = vst [vmem:[%s1232_s8 + $0xd8] sm:$0xff] %v463_v36 }
 0x163   : > { %496 = vst [vmem:[%s1232_s8 + $0x50] sm:$0xff] %v378_v39  ;;  %512 = vst [vmem:[%s1232_s8 + $0xd0] sm:$0xff] %v458_v40  ;;  %v734_v41 = vpop.f32.mrb[12].mxu0  ;;  %v758_v42 = vpop.f32.mrb[12].mxu1 }
 0x164   : > { %v393_v43 = vadd.f32 %v734_v41, %v1224_v56  ;;  %v473_v44 = vadd.f32 %v758_v42, %v1224_v56  ;;  %v387_v45 = vpop.f32.mrb[13].mxu0  ;;  %v467_v46 = vpop.f32.mrb[13].mxu1 }
 0x165   : > { %v388_v47 = vadd.f32 %v1224_v56, %v387_v45  ;;  %v468_v48 = vadd.f32 %v1224_v56, %v467_v46 }
 0x166   : > { %499 = vst [vmem:[%s1232_s8 + $0x68] sm:$0xff] %v393_v43  ;;  %515 = vst [vmem:[%s1232_s8 + $0xe8] sm:$0xff] %v473_v44 }
 0x167   : > { %498 = vst [vmem:[%s1232_s8 + $0x60] sm:$0xff] %v388_v47  ;;  %514 = vst [vmem:[%s1232_s8 + $0xe0] sm:$0xff] %v468_v48  ;;  %v737_v49 = vpop.f32.mrb[14].mxu0  ;;  %v761_v50 = vpop.f32.mrb[14].mxu1 }
 0x168   : > { %v403_v51 = vadd.f32 %v737_v49, %v1224_v56  ;;  %v483_v52 = vadd.f32 %v761_v50, %v1224_v56  ;;  %v397_v53 = vpop.f32.mrb[15].mxu0  ;;  %v477_v54 = vpop.f32.mrb[15].mxu1 }
 0x169   : > { %v398_v55 = vadd.f32 %v1224_v56, %v397_v53  ;;  %v478_v57 = vadd.f32 %v1224_v56, %v477_v54 }
 0x16a   : > { %501 = vst [vmem:[%s1232_s8 + $0x78] sm:$0xff] %v403_v51  ;;  %517 = vst [vmem:[%s1232_s8 + $0xf8] sm:$0xff] %v483_v52 }
 0x16b   : > { %500 = vst [vmem:[%s1232_s8 + $0x70] sm:$0xff] %v398_v55  ;;  %516 = vst [vmem:[%s1232_s8 + $0xf0] sm:$0xff] %v478_v57 }
 0x16c   : > { %942 = shalt.err (!%p939_p7)
}
 0x16d   : > { %s943_s30 = scalar_lea.hbm %s1293_s5, 4096  ;;  %s947_s10 = scalar_lea.hbm %s1348_s3, 8192 }
 0x16e   : > { %p944_p9 = scmp.ne.s32.totalorder %s1293_s5, %s943_s30  ;;  %p948_p5 = scmp.lt.u32.totalorder %s1293_s5, %s1348_s3 }
 0x16f   : > { %p949_p11 = scmp.lt.u32.totalorder %s947_s10, %s943_s30  ;;  %p951_p4 = scmp.lt.u32.totalorder %s943_s30, %s1293_s5 }
 0x170   : > { %p945_p1 = pnand %p944_p9, %p1122_p12 }
 0x171   : > { %p950_p2 = por %p949_p11, %p948_p5 }
 0x172   : > { %p946_p0 = pneg %p945_p1 }
 0x173   : > { %p952_p6 = por %p951_p4, %p950_p2 }
 0x175   : > { %p953_p8 = pnand %p952_p6, %p946_p0 }
 0x177   : > { %956 = shalt.err (!%p953_p8)
}
 0x178   : > { %s1006_s20 = smov 128   ;;  %s1007_s8 = smov 8  }
 0x179   : > { %816 = dma.vmem_to_hbm [thread:$0]  (%p1122_p12), %s1295_s4, 4096, %s1293_s5, %s519_s11, %s1006_s20, %s1006_s20, %s1007_s8  }
 0x17a PF: > { %s547_s9 = sand.u32 1, %s987_s12   ;;  %p1363_p10 = scmp.ne.s32.totalorder %s1353_s19, 0 }
 0x17b   : > { %p1364_p13 = scmp.ge.s32.totalorder %s999_s15, 2  ;;  %s548_s16 = scalar_lea.sflag [#allocation4], %s547_s9 }
 0x17d   : > { %p827_p3 = pnand %p1364_p13, %p1363_p10 }
 0x17f   : > { %982 = dma.done.wait (!%p827_p3), %s548_s16, 4096  }
 0x180   : > { %984 = vsyncadd (!%p827_p3), %s548_s16, 4294963200  ;;  %p17_p7 = scmp.ge.s32.totalorder %s1084_s24, 4   ;;  %s1365_s12 = smov %s991_s13 }
 0x181   : > { %s1366_s13 = smov %s995_s14  ;;  %s1367_s14 = smov %s1118_s17 }
 0x182   : > { %s1368_s15 = smov %s1084_s24  ;;  %19 = sbr.rel (!%p17_p7) target bundleno = 6 (0x6), region = 81 }
 0x189   :  { %553 = vsyncpa [#allocation3], 1 }
 0x18a   :  { %555 = vsyncpa [#allocation3 + $0x1], 1 }
 0x18b   :  { %556 = vsyncpa [#allocation6], 1 }
 0x18c   :  { %557 = vsyncpa [#allocation4], 1 }
 0x18d   :  { %559 = vsyncpa [#allocation4 + $0x1], 1 }

</bundles_post_ra>
